<compile_context>
chip_gen: v7x
topology: tpu7x:2x2x1
jax: 0.10.0
libtpu: 0.0.40
codegen_flags: <defaults>
</compile_context>

<pallas_src>
import functools

import jax
import jax.numpy as jnp
import numpy as np
from jax.experimental import pallas as pl
from jax.experimental.pallas import tpu as pltpu


def _piece_conv_kernel(x_ref, w_ref, b_ref, o_ref, *, D, H):
    # x_ref: (1, Cin, D*H)   one batch element; channels on sublanes, D*H on lanes
    # w_ref: (5, Cout, Cin)  taps: [center(merged), h-1, h+1, d-1, d+1]
    # b_ref: (Cout, 1)       combined bias b1 + b2
    # o_ref: (1, Cout, D*H)
    DH = D * H
    x = x_ref[0]                                   # (Cin, DH)
    cin = x.shape[0]

    lane = jax.lax.broadcasted_iota(jnp.int32, (cin, DH), 1)
    h = lane % H                                   # position within an H-row

    # Shifted taps via XLU lane rotation + boundary masking (zero padding).
    # pltpu.roll(x, s, 1): out[p] = x[(p - s) % DH]  (jnp.roll semantics).
    x_hm = jnp.where(h == 0, 0.0, pltpu.roll(x, 1, 1))              # x[d, h-1]
    x_hp = jnp.where(h == H - 1, 0.0, pltpu.roll(x, DH - 1, 1))     # x[d, h+1]
    x_dm = jnp.where(lane < H, 0.0, pltpu.roll(x, H, 1))            # x[d-1, h]
    x_dp = jnp.where(lane >= DH - H, 0.0, pltpu.roll(x, DH - H, 1)) # x[d+1, h]

    # 5 MXU matmuls: (Cout, Cin) x (Cin, DH) -> (Cout, DH), f32 accumulation.
    acc = jnp.dot(w_ref[0], x, preferred_element_type=jnp.float32)
    acc += jnp.dot(w_ref[1], x_hm, preferred_element_type=jnp.float32)
    acc += jnp.dot(w_ref[2], x_hp, preferred_element_type=jnp.float32)
    acc += jnp.dot(w_ref[3], x_dm, preferred_element_type=jnp.float32)
    acc += jnp.dot(w_ref[4], x_dp, preferred_element_type=jnp.float32)
    acc += b_ref[...]                              # (Cout, 1) broadcast over lanes

    o_ref[0] = acc.astype(o_ref.dtype)


def piece3dconv_forward(x, w1, b1, w2, b2):
    """x: (N, Cin, D, H); w1: (Cout, Cin, 1, 3, 3); w2: (Cout, Cin, 3, 1, 1)."""
    N, Cin, D, H = x.shape
    Cout = w1.shape[0]
    DH = D * H
    f32 = jnp.float32

    # Effective 1-D taps (exact: off-center W taps of w1 only ever hit zero
    # padding since the W extent is 1).  Merge the two coincident center taps.
    w_hm = w1[:, :, 0, 0, 1]                       # reads x[d, h-1]
    w_hp = w1[:, :, 0, 2, 1]                       # reads x[d, h+1]
    w_dm = w2[:, :, 0, 0, 0]                       # reads x[d-1, h]
    w_dp = w2[:, :, 2, 0, 0]                       # reads x[d+1, h]
    w_c = w1[:, :, 0, 1, 1] + w2[:, :, 1, 0, 0]    # both read x[d, h]
    w_stack = jnp.stack([w_c, w_hm, w_hp, w_dm, w_dp], axis=0).astype(f32)
    bias = (b1 + b2).reshape(Cout, 1).astype(f32)

    # Keep the PyTorch NCDH layout; just collapse (D, H) onto the lane axis.
    x_flat = x.reshape(N, Cin, DH)

    kernel = functools.partial(_piece_conv_kernel, D=D, H=H)
    out = pl.pallas_call(
        kernel,
        out_shape=jax.ShapeDtypeStruct((N, Cout, DH), x.dtype),
        grid=(N,),
        in_specs=[
            pl.BlockSpec((1, Cin, DH), lambda n: (n, 0, 0)),
            pl.BlockSpec((5, Cout, Cin), lambda n: (0, 0, 0)),
            pl.BlockSpec((Cout, 1), lambda n: (0, 0)),
        ],
        out_specs=pl.BlockSpec((1, Cout, DH), lambda n: (n, 0, 0)),
        compiler_params=pltpu.CompilerParams(
            dimension_semantics=("parallel",)),
    )(x_flat, w_stack, bias)

    return out.reshape(N, Cout, D, H)


def piece3dconv_reference(x, w1, b1, w2, b2):
    """Pure-JAX reference matching the PyTorch module exactly (3-D convs)."""
    x5 = x[..., None]  # (N, Cin, D, H, 1)
    dn = ("NCDHW", "OIDHW", "NCDHW")
    o1 = jax.lax.conv_general_dilated(
        x5, w1, window_strides=(1, 1, 1),
        padding=((0, 0), (1, 1), (1, 1)), dimension_numbers=dn)
    o1 = o1 + b1[None, :, None, None, None]
    o2 = jax.lax.conv_general_dilated(
        x5, w2, window_strides=(1, 1, 1),
        padding=((1, 1), (0, 0), (0, 0)), dimension_numbers=dn)
    o2 = o2 + b2[None, :, None, None, None]
    return (o1 + o2)[..., 0]  # (N, Cout, D, H)


if __name__ == "__main__":
    N, Cin, Cout, D, H = 2, 4, 8, 16, 16
    key = jax.random.PRNGKey(0)
    kx, kw1, kb1, kw2, kb2 = jax.random.split(key, 5)

    x = jax.random.normal(kx, (N, Cin, D, H), jnp.float32)
    # Deterministic synthetic parameters (shapes from nn.Conv3d in __init__).
    w1 = jax.random.normal(kw1, (Cout, Cin, 1, 3, 3), jnp.float32) * 0.1
    b1 = jax.random.normal(kb1, (Cout,), jnp.float32) * 0.1
    w2 = jax.random.normal(kw2, (Cout, Cin, 3, 1, 1), jnp.float32) * 0.1
    b2 = jax.random.normal(kb2, (Cout,), jnp.float32) * 0.1

    out = piece3dconv_forward(x, w1, b1, w2, b2)
    jax.block_until_ready(out)

    ref = piece3dconv_reference(x, w1, b1, w2, b2)
    assert out.shape == (N, Cout, D, H)
    np.testing.assert_allclose(np.asarray(out), np.asarray(ref),
                               rtol=1e-4, atol=1e-4)
    print("KERNEL_OK")
</pallas_src>

<mosaic_0001>
module attributes {stable_mosaic.version = 11 : i64} {
  func.func @_piece_conv_kernel(%arg0: i32, %arg1: memref<1x4x256xf32, #tpu.memory_space<vmem>>, %arg2: memref<5x8x4xf32, #tpu.memory_space<vmem>>, %arg3: memref<8x1xf32, #tpu.memory_space<vmem>>, %arg4: memref<1x8x256xf32, #tpu.memory_space<vmem>>) attributes {dimension_semantics = [#tpu.dimension_semantics<parallel>], iteration_bounds = array<i64: 2>, scalar_prefetch = 0 : i64, scratch_operands = 0 : i64, tpu.core_type = #tpu.core_type<tc>, window_params = [{transform_indices = @transform_0, window_bounds = array<i64: 1, 4, 256>}, {pipeline_mode = #tpu.pipeline_mode<synchronous>, transform_indices = @transform_1, window_bounds = array<i64: 5, 8, 4>}, {pipeline_mode = #tpu.pipeline_mode<synchronous>, transform_indices = @transform_2, window_bounds = array<i64: 8, 1>}, {transform_indices = @transform_3, window_bounds = array<i64: 1, 8, 256>}]} {
    %c0 = arith.constant 0 : index
    %c0_0 = arith.constant 0 : index
    %c0_1 = arith.constant 0 : index
    %0 = vector.load %arg1[%c0, %c0_0, %c0_1] : memref<1x4x256xf32, #tpu.memory_space<vmem>>, vector<1x4x256xf32>
    %1 = vector.shape_cast %0 : vector<1x4x256xf32> to vector<4x256xf32>
    %2 = tpu.iota {dimensions = array<i32: 1>} : vector<4x256xi32>
    %c16_i32 = arith.constant 16 : i32
    %c0_i32 = arith.constant 0 : i32
    %3 = arith.cmpi eq, %c16_i32, %c0_i32 : i32
    %c1_i32 = arith.constant 1 : i32
    %4 = arith.select %3, %c1_i32, %c16_i32 : i32
    %5 = vector.broadcast %4 : i32 to vector<4x256xi32>
    %6 = arith.remsi %2, %5 : vector<4x256xi32>
    %c0_i32_2 = arith.constant 0 : i32
    %7 = vector.broadcast %c0_i32_2 : i32 to vector<4x256xi32>
    %8 = arith.cmpi ne, %6, %7 : vector<4x256xi32>
    %c0_i32_3 = arith.constant 0 : i32
    %9 = vector.broadcast %c0_i32_3 : i32 to vector<4x256xi32>
    %10 = arith.cmpi slt, %6, %9 : vector<4x256xi32>
    %c0_i32_4 = arith.constant 0 : i32
    %11 = arith.cmpi slt, %4, %c0_i32_4 : i32
    %12 = vector.broadcast %11 : i1 to vector<4x256xi1>
    %13 = vector.broadcast %12 : vector<4x256xi1> to vector<4x256xi1>
    %14 = arith.xori %10, %13 : vector<4x256xi1>
    %15 = arith.andi %14, %8 : vector<4x256xi1>
    %16 = vector.broadcast %4 : i32 to vector<4x256xi32>
    %17 = arith.addi %6, %16 : vector<4x256xi32>
    %18 = arith.select %15, %17, %6 : vector<4x256xi1>, vector<4x256xi32>
    %c0_i32_5 = arith.constant 0 : i32
    %19 = vector.broadcast %c0_i32_5 : i32 to vector<4x256xi32>
    %20 = arith.cmpi eq, %18, %19 : vector<4x256xi32>
    %c1_i32_6 = arith.constant 1 : i32
    %21 = tpu.dynamic_rotate %1 by %c1_i32_6 dim 1 : vector<4x256xf32>, i32 -> vector<4x256xf32>
    %cst = arith.constant 0.000000e+00 : f32
    %22 = vector.broadcast %cst : f32 to vector<4x256xf32>
    %23 = arith.select %20, %22, %21 : vector<4x256xi1>, vector<4x256xf32>
    %c15_i32 = arith.constant 15 : i32
    %24 = vector.broadcast %c15_i32 : i32 to vector<4x256xi32>
    %25 = arith.cmpi eq, %18, %24 : vector<4x256xi32>
    %c255_i32 = arith.constant 255 : i32
    %26 = tpu.dynamic_rotate %1 by %c255_i32 dim 1 : vector<4x256xf32>, i32 -> vector<4x256xf32>
    %cst_7 = arith.constant 0.000000e+00 : f32
    %27 = vector.broadcast %cst_7 : f32 to vector<4x256xf32>
    %28 = arith.select %25, %27, %26 : vector<4x256xi1>, vector<4x256xf32>
    %c16_i32_8 = arith.constant 16 : i32
    %29 = vector.broadcast %c16_i32_8 : i32 to vector<4x256xi32>
    %30 = arith.cmpi slt, %2, %29 : vector<4x256xi32>
    %c16_i32_9 = arith.constant 16 : i32
    %31 = tpu.dynamic_rotate %1 by %c16_i32_9 dim 1 : vector<4x256xf32>, i32 -> vector<4x256xf32>
    %cst_10 = arith.constant 0.000000e+00 : f32
    %32 = vector.broadcast %cst_10 : f32 to vector<4x256xf32>
    %33 = arith.select %30, %32, %31 : vector<4x256xi1>, vector<4x256xf32>
    %c240_i32 = arith.constant 240 : i32
    %34 = vector.broadcast %c240_i32 : i32 to vector<4x256xi32>
    %35 = arith.cmpi sge, %2, %34 : vector<4x256xi32>
    %c240_i32_11 = arith.constant 240 : i32
    %36 = tpu.dynamic_rotate %1 by %c240_i32_11 dim 1 : vector<4x256xf32>, i32 -> vector<4x256xf32>
    %cst_12 = arith.constant 0.000000e+00 : f32
    %37 = vector.broadcast %cst_12 : f32 to vector<4x256xf32>
    %38 = arith.select %35, %37, %36 : vector<4x256xi1>, vector<4x256xf32>
    %c0_13 = arith.constant 0 : index
    %c0_14 = arith.constant 0 : index
    %c0_15 = arith.constant 0 : index
    %39 = vector.load %arg2[%c0_13, %c0_14, %c0_15] : memref<5x8x4xf32, #tpu.memory_space<vmem>>, vector<1x8x4xf32>
    %40 = vector.shape_cast %39 : vector<1x8x4xf32> to vector<8x4xf32>
    %cst_16 = arith.constant dense<0.000000e+00> : vector<8x256xf32>
    %41 = tpu.matmul %40, %1, %cst_16 {dimension_numbers = #tpu.dot_dimension_numbers<[1], [0], [0], [1], [0, 0, 1, 1], [], []>} : vector<8x4xf32>, vector<4x256xf32>, vector<8x256xf32> -> vector<8x256xf32>
    %c1 = arith.constant 1 : index
    %c0_17 = arith.constant 0 : index
    %c0_18 = arith.constant 0 : index
    %42 = vector.load %arg2[%c1, %c0_17, %c0_18] : memref<5x8x4xf32, #tpu.memory_space<vmem>>, vector<1x8x4xf32>
    %43 = vector.shape_cast %42 : vector<1x8x4xf32> to vector<8x4xf32>
    %cst_19 = arith.constant dense<0.000000e+00> : vector<8x256xf32>
    %44 = tpu.matmul %43, %23, %cst_19 {dimension_numbers = #tpu.dot_dimension_numbers<[1], [0], [0], [1], [0, 0, 1, 1], [], []>} : vector<8x4xf32>, vector<4x256xf32>, vector<8x256xf32> -> vector<8x256xf32>
    %45 = arith.addf %41, %44 : vector<8x256xf32>
    %c2 = arith.constant 2 : index
    %c0_20 = arith.constant 0 : index
    %c0_21 = arith.constant 0 : index
    %46 = vector.load %arg2[%c2, %c0_20, %c0_21] : memref<5x8x4xf32, #tpu.memory_space<vmem>>, vector<1x8x4xf32>
    %47 = vector.shape_cast %46 : vector<1x8x4xf32> to vector<8x4xf32>
    %cst_22 = arith.constant dense<0.000000e+00> : vector<8x256xf32>
    %48 = tpu.matmul %47, %28, %cst_22 {dimension_numbers = #tpu.dot_dimension_numbers<[1], [0], [0], [1], [0, 0, 1, 1], [], []>} : vector<8x4xf32>, vector<4x256xf32>, vector<8x256xf32> -> vector<8x256xf32>
    %49 = arith.addf %45, %48 : vector<8x256xf32>
    %c3 = arith.constant 3 : index
    %c0_23 = arith.constant 0 : index
    %c0_24 = arith.constant 0 : index
    %50 = vector.load %arg2[%c3, %c0_23, %c0_24] : memref<5x8x4xf32, #tpu.memory_space<vmem>>, vector<1x8x4xf32>
    %51 = vector.shape_cast %50 : vector<1x8x4xf32> to vector<8x4xf32>
    %cst_25 = arith.constant dense<0.000000e+00> : vector<8x256xf32>
    %52 = tpu.matmul %51, %33, %cst_25 {dimension_numbers = #tpu.dot_dimension_numbers<[1], [0], [0], [1], [0, 0, 1, 1], [], []>} : vector<8x4xf32>, vector<4x256xf32>, vector<8x256xf32> -> vector<8x256xf32>
    %53 = arith.addf %49, %52 : vector<8x256xf32>
    %c4 = arith.constant 4 : index
    %c0_26 = arith.constant 0 : index
    %c0_27 = arith.constant 0 : index
    %54 = vector.load %arg2[%c4, %c0_26, %c0_27] : memref<5x8x4xf32, #tpu.memory_space<vmem>>, vector<1x8x4xf32>
    %55 = vector.shape_cast %54 : vector<1x8x4xf32> to vector<8x4xf32>
    %cst_28 = arith.constant dense<0.000000e+00> : vector<8x256xf32>
    %56 = tpu.matmul %55, %38, %cst_28 {dimension_numbers = #tpu.dot_dimension_numbers<[1], [0], [0], [1], [0, 0, 1, 1], [], []>} : vector<8x4xf32>, vector<4x256xf32>, vector<8x256xf32> -> vector<8x256xf32>
    %57 = arith.addf %53, %56 : vector<8x256xf32>
    %c0_29 = arith.constant 0 : index
    %c0_30 = arith.constant 0 : index
    %58 = vector.load %arg3[%c0_29, %c0_30] : memref<8x1xf32, #tpu.memory_space<vmem>>, vector<8x1xf32>
    %59 = vector.broadcast %58 : vector<8x1xf32> to vector<8x256xf32>
    %60 = arith.addf %57, %59 : vector<8x256xf32>
    %c0_31 = arith.constant 0 : index
    %c0_32 = arith.constant 0 : index
    %c0_33 = arith.constant 0 : index
    %61 = vector.load %arg4[%c0_31, %c0_32, %c0_33] : memref<1x8x256xf32, #tpu.memory_space<vmem>>, vector<1x8x256xf32>
    %62 = vector.shape_cast %61 : vector<1x8x256xf32> to vector<8x256xf32>
    %63 = vector.shape_cast %60 : vector<8x256xf32> to vector<1x8x256xf32>
    tpu.vector_store %arg4[%c0_31, %c0_32, %c0_33], %63 {strides = array<i32>} : memref<1x8x256xf32, #tpu.memory_space<vmem>>, vector<1x8x256xf32>,
    return
  }
  func.func @transform_0(%arg0: i32) -> (i32, i32, i32) {
    %c0_i32 = arith.constant 0 : i32
    %c0_i32_0 = arith.constant 0 : i32
    %c0_i32_1 = arith.constant 0 : i32
    return %arg0, %c0_i32, %c0_i32_0 : i32, i32, i32
  }
  func.func @transform_1(%arg0: i32) -> (i32, i32, i32) {
    %c0_i32 = arith.constant 0 : i32
    %c0_i32_0 = arith.constant 0 : i32
    %c0_i32_1 = arith.constant 0 : i32
    %c0_i32_2 = arith.constant 0 : i32
    return %c0_i32, %c0_i32_0, %c0_i32_1 : i32, i32, i32
  }
  func.func @transform_2(%arg0: i32) -> (i32, i32) {
    %c0_i32 = arith.constant 0 : i32
    %c0_i32_0 = arith.constant 0 : i32
    %c0_i32_1 = arith.constant 0 : i32
    return %c0_i32, %c0_i32_0 : i32, i32
  }
  func.func @transform_3(%arg0: i32) -> (i32, i32, i32) {
    %c0_i32 = arith.constant 0 : i32
    %c0_i32_0 = arith.constant 0 : i32
    %c0_i32_1 = arith.constant 0 : i32
    return %arg0, %c0_i32, %c0_i32_0 : i32, i32, i32
  }
}

</mosaic_0001>

<bundles_post_ra>
// kernel: tpu_custom_call.1
= control target key start
LH: loop header
LB: loop body
LE: loop exit
PB: predicated region body
PF: predicated region fallthrough
CT: control target
= control target key end

     0   :  { %8 = vsyncpa [#allocation3], 0  ;;  %s1095_s0 = inlined_call_operand.vmem [shape: f32[2,4,256], index: 0, kind: input, shape index: {}]   ;;  %s1096_s1 = inlined_call_operand.vmem [shape: f32[5,8,4], index: 1, kind: input, shape index: {}]   ;;  %s1097_s2 = inlined_call_operand.vmem [shape: f32[8,1], index: 2, kind: input, shape index: {}]   ;;  %s1098_s3 = inlined_call_operand.hbm [shape: f32[2,8,256], index: 3, kind: output, shape index: {}]  }
   0x1   :  { %10 = vsyncpa [#allocation3 + $0x1], 0  ;;  %s921_s12 = smov 0   ;;  %s923_s13 = smov 0  }
   0x2   :  { %s925_s14 = smov 0   ;;  %s927_s15 = smov 0  }
   0x3 LB: > { %s942_s16 = sadd.s32 4294967295, %s892_s15   ;;  %s742_s17 = sadd.s32 4294967294, %s892_s15   ;;  %s892_s15 = sphi %s927_s15, %s1112_s15   ;;  %s888_s14 = sphi %s925_s14, %s1111_s14   ;;  %s884_s13 = sphi %s923_s13, %s1110_s13   ;;  %s880_s12 = sphi %s921_s12, %s1109_s12  }
   0x4   : > { %s946_s18 = sadd.s32 1, %s892_s15   ;;  %s91_s19 = sadd.s32 1, %s888_s14 }
   0x5   : > { %s88_s20 = ssub.s32 %s892_s15, %s946_s18  ;;  %p101_p0 = scmp.ne.s32.totalorder %s888_s14, %s884_s13 }
   0x6   : > { %p89_p1 = scmp.eq.s32.totalorder %s88_s20, 0  ;;  %p102_p2 = scmp.eq.s32.totalorder %s942_s16, 1 }
   0x7   : > { %p107_p3 = scmp.ne.s32.totalorder %s884_s13, %s880_s12  ;;  %p108_p4 = scmp.eq.s32.totalorder %s742_s17, 1 }
   0x8   : > { %s957_s21 = scalar_select %p89_p1, %s888_s14, %s91_s19  }
   0x9   : > { %p959_p5 = por %p102_p2, %p101_p0  ;;  %p963_p6 = por %p108_p4, %p107_p3 }
   0xa   : > { %p745_p7 = scmp.ge.s32.totalorder %s892_s15, 1  ;;  %p140_p8 = scmp.lt.s32.totalorder %s892_s15, 3 }
   0xc   : > { %p141_p9 = pnand %p745_p7, %p140_p8 }
   0xd   : > { %p164_p10 = scmp.lt.s32.totalorder (!%p141_p9), %s942_s16, 1  ;;  %v894_v0 = vmov (!%p141_p9), 0.0   ;;  %s895_s29 = smov (!%p141_p9), 1   ;;  %v899_v3 = vmov (!%p141_p9), 0   ;;  %v658_v4 = vld [vmem:[%s1097_s2] sm:$0xff] (!%p141_p9)  ;;  %v170_v5 = vlaneseq (!%p141_p9)  ;;  %vm250_vm6 = vcmask (!%p141_p9), 1043456  }
   0xe   : > { %144 = sbr.rel (%p141_p9) target bundleno = 396 (0x18c), region = 32  ;;  %481 = vmatprep.mubr.f32.mxu0 (!%p141_p9), %v894_v0  ;;  %321 = vmatprep.mubr.f32.mxu1 (!%p141_p9), %v894_v0  ;;  %s896_s30 = smov (!%p141_p9), 127   ;;  %vm246_vm8 = vcmask (!%p141_p9), 31744   ;;  %v756_v26 = vld [vmem:[%s1096_s1 + $0x10] sm:$0xff] (!%p141_p9)  ;;  %v749_v27 = vld [vmem:[%s1096_s1 + $0x8] sm:$0xff] (!%p141_p9)  ;;  %v760_v37 = vld [vmem:[%s1096_s1 + $0x18] sm:$0xff] (!%p141_p9) }
   0xf   : > { %s897_s4 = smov (!%p141_p9), 16   ;;  %s898_s5 = smov (!%p141_p9), 112   ;;  %828 = vset.pattern.permute.xlu0 (!%p141_p9), %v899_v3  ;;  %v171_v6 = vand.u32 (!%p141_p9), 127, %v170_v5  ;;  %v243_v38 = vld [vmem:[%s1096_s1] sm:$0xff] (!%p141_p9) }
  0x10   : > { %v764_v40 = vld [vmem:[%s1096_s1 + $0x20] sm:$0xff] (!%p141_p9)  ;;  %s161_s27 = sand.u32 (!%p141_p9), 1, %s884_s13  }
  0x11   : > { %v172_v7 = vadd.s32 (!%p141_p9), 128, %v171_v6  ;;  %v177_v9 = vand.u32 (!%p141_p9), 15, %v171_v6  ;;  %vm206_vm0 = vcmp.lt.s32.totalorder (!%p141_p9), %v171_v6, 1  ;;  %vm217_vm1 = vcmp.lt.s32.totalorder (!%p141_p9), %v171_v6, 127  ;;  %s669_s8 = scalar_lea.sflag (!%p141_p9), [#allocation3], %s161_s27 }
  0x12   : > { %vm222_vm7 = vcmp.lt.s32.totalorder (!%p141_p9), %v171_v6, 16  ;;  %vm238_vm9 = vcmp.lt.s32.totalorder (!%p141_p9), %v171_v6, 112 }
  0x13   : > { %v184_v8 = vand.u32 (!%p141_p9), 15, %v172_v7  ;;  %vm995_vm4 = vcmp.eq.s32.totalorder (!%p141_p9), %v177_v9, 0  ;;  %vm999_vm5 = vcmp.eq.s32.totalorder (!%p141_p9), %v177_v9, 15  ;;  %vm233_vm10 = vcmp.ge.s32.totalorder (!%p141_p9), %v172_v7, 240 }
  0x15   : > { %s165_s24 = scalar_select %p164_p10, %s942_s16, 1  ;;  %vm987_vm2 = vcmp.eq.s32.totalorder %v184_v8, 0  ;;  %vm991_vm3 = vcmp.eq.s32.totalorder %v184_v8, 15 }
  0x17   : > { %s773_s25 = sshll.u32 %s165_s24, 3 }
  0x18   : > { %s168_s28 = scalar_lea.vmem %s1095_s0, %s773_s25 }
  0x19   : > { %v976_v1 = vld [vmem:[%s168_s28] sm:$0xff]  ;;  %s746_s28 = sshll.u32 %s161_s27, 4 }
  0x1a   : > { %202 = vrot.lane.b32.xlu1 %v976_v1, %s895_s29  ;;  %213 = vrot.lane.b32.xlu0 %v976_v1, %s896_s30  ;;  %v200_v2 = vcombine.high %v976_v1, %v976_v1 }
  0x1e   : > { %204 = vrot.lane.b32.xlu1 %v200_v2, %s895_s29  ;;  %215 = vrot.lane.b32.xlu0 %v200_v2, %s896_s30  ;;  %s774_s29 = sshll.u32 %s942_s16, 8  ;;  %s163_s30 = scalar_lea.vmem [#allocation2], %s746_s28 }
  0x1f   : > { %s1053_s7 = scalar_lea.hbm %s1098_s3, %s774_s29  ;;  %s900_s16 = smov [#allocation2]  }
  0x20   : > { %s834_s10 = sshll.u32 %s900_s16, 4  ;;  %s835_s10 = int_to_ptr.vmem [resolvable:$false] %s834_s10 }
  0x21   : > { %s836_s11 = scalar_lea.vmem %s835_s10, 512 }
  0x22   : > { %226 = vrot.lane.b32.xlu1 %v200_v2, %s897_s4  ;;  %224 = vrot.lane.b32.xlu0 %v976_v1, %s897_s4  ;;  %s683_s4 = sshll.u32 %s163_s30, 4  ;;  %s1055_s4 = int_to_ptr.vmem [resolvable:$true] %s683_s4 }
  0x23   : > { %s830_s9 = scalar_lea.vmem %s1055_s4, 256  ;;  %p837_p0 = scmp.lt.s32.totalorder %s1055_s4, %s835_s10 }
  0x24   : > { %p831_p11 = scmp.ne.s32.totalorder %s1055_s4, %s830_s9  ;;  %p838_p1 = scmp.lt.s32.totalorder %s836_s11, %s830_s9 }
  0x26   : > { %236 = vrot.lane.b32.xlu1 %v200_v2, %s898_s5  ;;  %234 = vrot.lane.b32.xlu0 %v976_v1, %s898_s5  ;;  %p832_p12 = pnand %p831_p11, %p959_p5  ;;  %p839_p2 = por %p838_p1, %p837_p0 }
  0x28   : > { %p833_p13 = pneg %p832_p12 }
  0x2a   : > { %661 = vperm.xlu0 %828, %v658_v4   ;;  %p840_p3 = pnand %p839_p2, %p833_p13 }
  0x8c   : > { %v203_v10 = vpop.permute.xlu1 %202  ;;  %v214_v11 = vpop.permute.xlu0 %213 }
  0x90   : > { %v205_v16 = vpop.permute.xlu1 %204  ;;  %v216_v17 = vpop.permute.xlu0 %215 }
  0x91   : > { %v208_v18 = vsel %vm206_vm0, %v205_v16, %v203_v10  ;;  %v218_v19 = vsel %vm217_vm1, %v214_v11, %v216_v17  ;;  %v207_v20 = vsel %vm206_vm0, %v203_v10, %v205_v16  ;;  %v219_v21 = vsel %vm217_vm1, %v216_v17, %v214_v11 }
  0x92   : > { %v210_v22 = vsel %vm987_vm2, 0.0, %v207_v20  ;;  %v221_v23 = vsel %vm991_vm3, 0.0, %v219_v21  ;;  %v209_v24 = vsel %vm995_vm4, 0.0, %v208_v18  ;;  %v220_v25 = vsel %vm999_vm5, 0.0, %v218_v19 }
  0x93   : > { %750 = vmatprep.subr.msk.mxu1 %vm250_vm6, %v210_v22  ;;  %757 = vmatprep.subr.msk.mxu0 %vm250_vm6, %v221_v23 }
  0x94   : > { %751 = vmatpush1.msk.msra.mxu1 %vm250_vm6, %v209_v24  ;;  %v227_v28 = vpop.permute.xlu1 %226  ;;  %758 = vmatpush1.msk.msra.mxu0 %vm250_vm6, %v220_v25  ;;  %v225_v29 = vpop.permute.xlu0 %224 }
  0x95   : > { %v228_v30 = vsel %vm222_vm7, %v225_v29, %v227_v28  ;;  %v229_v31 = vsel %vm222_vm7, %v227_v28, %v225_v29  ;;  %759 = vmatmul.mubr.msk.f32.vlgmr.msra.gmra.mrb[0].mxu0 %vm246_vm8, %v756_v26  ;;  %752 = vmatmul.mubr.msk.f32.vlgmr.msra.gmra.mrb[0].mxu1 %vm246_vm8, %v749_v27 }
  0x96   : > { %v230_v32 = vsel %vm222_vm7, 0.0, %v229_v31  ;;  %761 = vmatprep.subr.msk.mxu0 %vm250_vm6, %v228_v30  ;;  %753 = vmatprep.subr.msk.mxu1 %vm250_vm6, %v200_v2 }
  0x97   : > { %762 = vmatpush1.msk.msra.mxu0 %vm250_vm6, %v230_v32  ;;  %565 = vmatprep.mubr.f32.mxu0 %v894_v0 }
  0x98   : > { %v237_v33 = vpop.permute.xlu1 %236  ;;  %v235_v34 = vpop.permute.xlu0 %234  ;;  %754 = vmatpush1.msk.msra.mxu1 %vm250_vm6, %v976_v1  ;;  %399 = vmatprep.mubr.f32.mxu1 %v894_v0 }
  0x99   : > { %v240_v35 = vsel %vm238_vm9, %v237_v33, %v235_v34  ;;  %v239_v39 = vsel %vm238_vm9, %v235_v34, %v237_v33 }
  0x9a   : > { %v242_v36 = vsel %vm233_vm10, 0.0, %v240_v35 }
  0x9b   : > { %765 = vmatprep.subr.msk.mxu0 %vm250_vm6, %v242_v36 }
  0x9d   : > { %763 = vmatmul.mubr.msk.f32.vlgmr.msra.gmra.mrb[0].mxu0 %vm246_vm8, %v760_v37  ;;  %755 = vmatmul.mubr.msk.f32.vlgmr.msra.gmra.mrb[0].mxu1 %vm246_vm8, %v243_v38 }
  0x9e   : > { %766 = vmatpush1.msk.msra.mxu0 %vm250_vm6, %v239_v39  ;;  %649 = vmatprep.mubr.f32.mxu0 %v894_v0 }
  0xa5   : > { %767 = vmatmul.mubr.msk.f32.vlgmr.msra.gmra.mrb[0].mxu0 %vm246_vm8, %v764_v40 }
  0xa9   : > { %v662_v44 = vpop.permute.xlu0 %661 }
 0x170   : > { %v401_v41 = vpop.f32.mrb[0].mxu1 }
 0x171   : > { %v403_v42 = vpop.f32.mrb[1].mxu1 }
 0x178   : > { %v651_v43 = vpop.f32.mrb[0].mxu0 }
 0x179   : > { %v775_v45 = vadd.f32 %v651_v43, %v401_v41  ;;  %v653_v46 = vpop.f32.mrb[1].mxu0 }
 0x17a   : > { %v776_v47 = vadd.f32 %v653_v46, %v403_v42 }
 0x17b   : > { %v664_v48 = vadd.f32 %v775_v45, %v662_v44 }
 0x17c   : > { %v665_v49 = vadd.f32 %v776_v47, %v662_v44 }
 0x17d   : > { %666 = vst [vmem:[%s163_s30] sm:$0xff] %v664_v48 }
 0x17e   : > { %667 = vst [vmem:[%s163_s30 + $0x8] sm:$0xff] %v665_v49 }
 0x17f   : > { %843 = shalt.err (!%p840_p3)
}
 0x180   : > { %s844_s17 = scalar_lea.hbm %s1053_s7, 256  ;;  %s848_s24 = scalar_lea.hbm %s1098_s3, 512 }
 0x181   : > { %p845_p4 = scmp.ne.s32.totalorder %s1053_s7, %s844_s17  ;;  %p849_p9 = scmp.lt.u32.totalorder %s1053_s7, %s1098_s3 }
 0x182   : > { %p850_p10 = scmp.lt.u32.totalorder %s848_s24, %s844_s17  ;;  %p852_p12 = scmp.lt.u32.totalorder %s844_s17, %s1053_s7 }
 0x183   : > { %p846_p7 = pnand %p845_p4, %p959_p5 }
 0x184   : > { %p851_p11 = por %p850_p10, %p849_p9 }
 0x185   : > { %p847_p8 = pneg %p846_p7 }
 0x186   : > { %p853_p13 = por %p852_p12, %p851_p11 }
 0x188   : > { %p854_p0 = pnand %p853_p13, %p847_p8 }
 0x18a   : > { %857 = shalt.err (!%p854_p0)
}
 0x18b   : > { %783 = dma.vmem_to_hbm [thread:$0]  (%p959_p5), %s1055_s4, 256, %s1053_s7, %s669_s8  }
 0x18c PF: > { %p789_p1 = scmp.ge.s32.totalorder %s892_s15, 2  ;;  %s695_s27 = sand.u32 1, %s880_s12  }
 0x18d   : > { %s696_s28 = scalar_lea.sflag [#allocation3], %s695_s27 }
 0x18e   : > { %p786_p2 = pnand %p789_p1, %p963_p6 }
 0x190   : > { %875 = dma.done.wait (!%p786_p2), %s696_s28, 256  }
 0x191   : > { %877 = vsyncadd (!%p786_p2), %s696_s28, 4294967040  ;;  %p13_p3 = scmp.ge.s32.totalorder %s946_s18, 4   ;;  %s1109_s12 = smov %s884_s13 }
 0x192   : > { %s1110_s13 = smov %s888_s14  ;;  %s1111_s14 = smov %s957_s21 }
 0x193   : > { %s1112_s15 = smov %s946_s18  ;;  %15 = sbr.rel (!%p13_p3) target bundleno = 3 (0x3), region = 71 }
 0x19a   :  { %701 = vsyncpa [#allocation3], 1 }
 0x19b   :  { %703 = vsyncpa [#allocation3 + $0x1], 1 }

</bundles_post_ra>
